<compile_context>
chip_gen: v7x
topology: tpu7x:2x2x1
jax: 0.10.0
libtpu: 0.0.40
codegen_flags: <defaults>
</compile_context>

<pallas_src>
import jax
import jax.numpy as jnp
from jax.experimental import pallas as pl
from jax.experimental.pallas import tpu as pltpu


def _make_fused_block_kernel(H, WC):
    """Fused BasicBlock kernel for one image in lane-dense (H, W*C) layout."""

    def kernel(x_ref, t1_ref, t2_ref, bias_ref, o_ref, xp_ref):
        x = x_ref[0]                                   # (H, WC) identity / conv1 input

        # Zero only the two halo rows (interior is fully overwritten below).
        zrow = jnp.zeros((1, WC), jnp.float32)
        xp_ref[0:1, :] = zrow
        xp_ref[H + 1:H + 2, :] = zrow
        xp_ref[1:H + 1, :] = x

        # ---- conv1 (3 banded MXU matmuls, bn1 scale folded into T1) + relu ----
        acc = jnp.zeros((H, WC), jnp.float32)
        for kh in range(3):
            acc = acc + jnp.dot(xp_ref[kh:kh + H, :], t1_ref[kh],
                                preferred_element_type=jnp.float32)
        y = jnp.maximum(acc + bias_ref[0:1], 0.0)

        # ---- conv2 (0.5*bn2 scale folded into T2) + 0.5*bias2 + 0.5*x + relu ----
        # Halo rows of xp_ref are still zero; refresh only the interior.
        xp_ref[1:H + 1, :] = y
        acc = jnp.zeros((H, WC), jnp.float32)
        for kh in range(3):
            acc = acc + jnp.dot(xp_ref[kh:kh + H, :], t2_ref[kh],
                                preferred_element_type=jnp.float32)
        o_ref[0] = jnp.maximum(acc + bias_ref[1:2] + 0.5 * x, 0.0)

    return kernel


def _build_band_weights(w_hwio, W):
    """(3,3,Cin,Cout) HWIO conv weights -> (3, W*Cin, W*Cout) block-banded
    matrices, so the width axis of a padded-by-1 3x3 conv becomes, per kh tap,
    one lane-dense matmul:  rows(H, W*Cin) @ T[kh] -> (H, W*Cout)."""
    _, _, Cin, Cout = w_hwio.shape
    wi = jnp.arange(W)
    # sel[kw, w_in, w_out] = 1  iff  w_in == w_out + kw - 1  (edges -> zero pad)
    sel = (wi[None, :, None] ==
           wi[None, None, :] + jnp.arange(3)[:, None, None] - 1)
    t = jnp.einsum('kac,hkio->haico', sel.astype(w_hwio.dtype), w_hwio)
    return t.reshape(3, W * Cin, W * Cout)


@jax.jit
def basic_block_forward_nhwc(x_nhwc, params):
    """Fused BasicBlock forward, channels-last input/output (preferred)."""
    N, H, W, C = x_nhwc.shape
    WC = W * C
    x2d = x_nhwc.reshape(N, H, WC)                     # lane-dense packing

    # Fold BN scales (and the 0.5 residual factor for bn2) into the banded
    # conv weights; the kernel only does bias-add + relu on the VPU.
    s1 = jnp.tile(params["s1"], W)                     # (WC,)
    s2h = jnp.tile(0.5 * params["s2"], W)
    t1 = _build_band_weights(params["w1"], W) * s1[None, None, :]   # (3, WC, WC)
    t2 = _build_band_weights(params["w2"], W) * s2h[None, None, :]
    bias = jnp.stack([                                 # (2, WC) per-lane biases
        jnp.tile(params["b1"], W),
        jnp.tile(0.5 * params["b2"], W),
    ])

    out2d = pl.pallas_call(
        _make_fused_block_kernel(H, WC),
        out_shape=jax.ShapeDtypeStruct((N, H, WC), jnp.float32),
        grid_spec=pltpu.PrefetchScalarGridSpec(
            num_scalar_prefetch=0,
            grid=(N,),                                 # parallel steps (v7x: 2 TCs)
            in_specs=[
                pl.BlockSpec((1, H, WC), lambda n: (n, 0, 0)),
                pl.BlockSpec((3, WC, WC), lambda n: (0, 0, 0)),
                pl.BlockSpec((3, WC, WC), lambda n: (0, 0, 0)),
                pl.BlockSpec((2, WC), lambda n: (0, 0)),
            ],
            out_specs=pl.BlockSpec((1, H, WC), lambda n: (n, 0, 0)),
            scratch_shapes=[pltpu.VMEM((H + 2, WC), jnp.float32)],
        ),
        compiler_params=pltpu.CompilerParams(
            dimension_semantics=("parallel",)),
    )(x2d, t1, t2, bias)
    return out2d.reshape(N, H, W, C)


def basic_block_forward(x_nchw, params):
    """PyTorch-layout (NCHW) convenience wrapper.  Prefer the NHWC entry point
    to avoid the two layout transposes at the block boundary."""
    x = jnp.transpose(x_nchw, (0, 2, 3, 1))            # NCHW -> NHWC
    out = basic_block_forward_nhwc(x, params)
    return jnp.transpose(out, (0, 3, 1, 2))            # NHWC -> NCHW


def init_basic_block_params(key, inplanes, planes, eps=1e-5):
    k1, k2, k3, k4 = jax.random.split(key, 4)
    # conv weights in HWIO layout (PyTorch OIHW -> HWIO), bias=False
    w1 = 0.1 * jax.random.normal(k1, (3, 3, inplanes, planes), jnp.float32)
    w2 = 0.1 * jax.random.normal(k2, (3, 3, planes, planes), jnp.float32)

    def bn_fold(k):
        kg, kb, km, kv = jax.random.split(k, 4)
        gamma = 1.0 + 0.1 * jax.random.normal(kg, (planes,), jnp.float32)
        beta = 0.1 * jax.random.normal(kb, (planes,), jnp.float32)
        mean = 0.1 * jax.random.normal(km, (planes,), jnp.float32)
        var = jax.random.uniform(kv, (planes,), jnp.float32, 0.5, 1.5)
        scale = gamma / jnp.sqrt(var + eps)
        bias = beta - mean * scale
        return scale, bias

    s1, b1 = bn_fold(k3)
    s2, b2 = bn_fold(k4)
    return dict(w1=w1, w2=w2, s1=s1, b1=b1, s2=s2, b2=b2)


def basic_block_reference(x_nchw, params):
    """Pure-JAX reference (lax conv) for correctness checking."""
    dn = ("NCHW", "HWIO", "NCHW")
    y = jax.lax.conv_general_dilated(x_nchw, params["w1"], (1, 1), "SAME",
                                     dimension_numbers=dn)
    y = y * params["s1"][None, :, None, None] + params["b1"][None, :, None, None]
    y = jnp.maximum(y, 0.0)
    z = jax.lax.conv_general_dilated(y, params["w2"], (1, 1), "SAME",
                                     dimension_numbers=dn)
    z = z * params["s2"][None, :, None, None] + params["b2"][None, :, None, None]
    return jnp.maximum(0.5 * z + 0.5 * x_nchw, 0.0)


if __name__ == "__main__":
    key = jax.random.PRNGKey(0)
    kx, kp = jax.random.split(key)

    N, C, H, W = 2, 8, 16, 16          # inplanes == planes == 8; W*C == 128 (lane-dense)
    x = jax.random.normal(kx, (N, C, H, W), jnp.float32)
    params = init_basic_block_params(kp, inplanes=C, planes=C)

    out = basic_block_forward(x, params)
    jax.block_until_ready(out)
    assert out.shape == (N, C, H, W)

    ref = basic_block_reference(x, params)
    err = float(jnp.max(jnp.abs(out - ref)))
    assert err < 1e-3, f"mismatch vs reference: {err}"
    print("KERNEL_OK")
</pallas_src>

<mosaic_0001>
module attributes {stable_mosaic.version = 11 : i64} {
  func.func @kernel(%arg0: i32, %arg1: memref<1x16x128xf32, #tpu.memory_space<vmem>>, %arg2: memref<3x128x128xf32, #tpu.memory_space<vmem>>, %arg3: memref<3x128x128xf32, #tpu.memory_space<vmem>>, %arg4: memref<2x128xf32, #tpu.memory_space<vmem>>, %arg5: memref<1x16x128xf32, #tpu.memory_space<vmem>>, %arg6: memref<18x128xf32, #tpu.memory_space<vmem>>) attributes {dimension_semantics = [#tpu.dimension_semantics<parallel>], iteration_bounds = array<i64: 2>, scalar_prefetch = 0 : i64, scratch_operands = 1 : i64, tpu.core_type = #tpu.core_type<tc>, window_params = [{transform_indices = @transform_0, window_bounds = array<i64: 1, 16, 128>}, {pipeline_mode = #tpu.pipeline_mode<synchronous>, transform_indices = @transform_1, window_bounds = array<i64: 3, 128, 128>}, {pipeline_mode = #tpu.pipeline_mode<synchronous>, transform_indices = @transform_2, window_bounds = array<i64: 3, 128, 128>}, {pipeline_mode = #tpu.pipeline_mode<synchronous>, transform_indices = @transform_3, window_bounds = array<i64: 2, 128>}, {transform_indices = @transform_4, window_bounds = array<i64: 1, 16, 128>}]} {
    %c0 = arith.constant 0 : index
    %c0_0 = arith.constant 0 : index
    %c0_1 = arith.constant 0 : index
    %0 = vector.load %arg1[%c0, %c0_0, %c0_1] : memref<1x16x128xf32, #tpu.memory_space<vmem>>, vector<1x16x128xf32>
    %1 = vector.shape_cast %0 : vector<1x16x128xf32> to vector<16x128xf32>
    %cst = arith.constant 0.000000e+00 : f32
    %2 = vector.broadcast %cst : f32 to vector<1x128xf32>
    %c0_2 = arith.constant 0 : index
    %c0_3 = arith.constant 0 : index
    %3 = vector.load %arg6[%c0_2, %c0_3] : memref<18x128xf32, #tpu.memory_space<vmem>>, vector<1x128xf32>
    tpu.vector_store %arg6[%c0_2, %c0_3], %2 {strides = array<i32>} : memref<18x128xf32, #tpu.memory_space<vmem>>, vector<1x128xf32>,
    %c17 = arith.constant 17 : index
    %c0_4 = arith.constant 0 : index
    %4 = vector.load %arg6[%c17, %c0_4] : memref<18x128xf32, #tpu.memory_space<vmem>>, vector<1x128xf32>
    tpu.vector_store %arg6[%c17, %c0_4], %2 {strides = array<i32>} : memref<18x128xf32, #tpu.memory_space<vmem>>, vector<1x128xf32>,
    %c1 = arith.constant 1 : index
    %c0_5 = arith.constant 0 : index
    %5 = vector.load %arg6[%c1, %c0_5] : memref<18x128xf32, #tpu.memory_space<vmem>>, vector<16x128xf32>
    tpu.vector_store %arg6[%c1, %c0_5], %1 {strides = array<i32>} : memref<18x128xf32, #tpu.memory_space<vmem>>, vector<16x128xf32>,
    %cst_6 = arith.constant 0.000000e+00 : f32
    %6 = vector.broadcast %cst_6 : f32 to vector<16x128xf32>
    %c0_7 = arith.constant 0 : index
    %c0_8 = arith.constant 0 : index
    %7 = vector.load %arg6[%c0_7, %c0_8] : memref<18x128xf32, #tpu.memory_space<vmem>>, vector<16x128xf32>
    %c0_9 = arith.constant 0 : index
    %c0_10 = arith.constant 0 : index
    %c0_11 = arith.constant 0 : index
    %8 = vector.load %arg2[%c0_9, %c0_10, %c0_11] : memref<3x128x128xf32, #tpu.memory_space<vmem>>, vector<1x128x128xf32>
    %9 = vector.shape_cast %8 : vector<1x128x128xf32> to vector<128x128xf32>
    %cst_12 = arith.constant dense<0.000000e+00> : vector<16x128xf32>
    %10 = tpu.matmul %7, %9, %cst_12 {dimension_numbers = #tpu.dot_dimension_numbers<[1], [0], [0], [1], [0, 0, 1, 1], [], []>} : vector<16x128xf32>, vector<128x128xf32>, vector<16x128xf32> -> vector<16x128xf32>
    %11 = arith.addf %6, %10 : vector<16x128xf32>
    %c1_13 = arith.constant 1 : index
    %c0_14 = arith.constant 0 : index
    %12 = vector.load %arg6[%c1_13, %c0_14] : memref<18x128xf32, #tpu.memory_space<vmem>>, vector<16x128xf32>
    %c1_15 = arith.constant 1 : index
    %c0_16 = arith.constant 0 : index
    %c0_17 = arith.constant 0 : index
    %13 = vector.load %arg2[%c1_15, %c0_16, %c0_17] : memref<3x128x128xf32, #tpu.memory_space<vmem>>, vector<1x128x128xf32>
    %14 = vector.shape_cast %13 : vector<1x128x128xf32> to vector<128x128xf32>
    %cst_18 = arith.constant dense<0.000000e+00> : vector<16x128xf32>
    %15 = tpu.matmul %12, %14, %cst_18 {dimension_numbers = #tpu.dot_dimension_numbers<[1], [0], [0], [1], [0, 0, 1, 1], [], []>} : vector<16x128xf32>, vector<128x128xf32>, vector<16x128xf32> -> vector<16x128xf32>
    %16 = arith.addf %11, %15 : vector<16x128xf32>
    %c2 = arith.constant 2 : index
    %c0_19 = arith.constant 0 : index
    %17 = vector.load %arg6[%c2, %c0_19] : memref<18x128xf32, #tpu.memory_space<vmem>>, vector<16x128xf32>
    %c2_20 = arith.constant 2 : index
    %c0_21 = arith.constant 0 : index
    %c0_22 = arith.constant 0 : index
    %18 = vector.load %arg2[%c2_20, %c0_21, %c0_22] : memref<3x128x128xf32, #tpu.memory_space<vmem>>, vector<1x128x128xf32>
    %19 = vector.shape_cast %18 : vector<1x128x128xf32> to vector<128x128xf32>
    %cst_23 = arith.constant dense<0.000000e+00> : vector<16x128xf32>
    %20 = tpu.matmul %17, %19, %cst_23 {dimension_numbers = #tpu.dot_dimension_numbers<[1], [0], [0], [1], [0, 0, 1, 1], [], []>} : vector<16x128xf32>, vector<128x128xf32>, vector<16x128xf32> -> vector<16x128xf32>
    %21 = arith.addf %16, %20 : vector<16x128xf32>
    %c0_24 = arith.constant 0 : index
    %c0_25 = arith.constant 0 : index
    %22 = vector.load %arg4[%c0_24, %c0_25] : memref<2x128xf32, #tpu.memory_space<vmem>>, vector<1x128xf32>
    %23 = vector.broadcast %22 : vector<1x128xf32> to vector<16x128xf32>
    %24 = arith.addf %21, %23 : vector<16x128xf32>
    %cst_26 = arith.constant 0.000000e+00 : f32
    %25 = vector.broadcast %cst_26 : f32 to vector<16x128xf32>
    %26 = arith.maximumf %24, %25 : vector<16x128xf32>
    %c1_27 = arith.constant 1 : index
    %c0_28 = arith.constant 0 : index
    %27 = vector.load %arg6[%c1_27, %c0_28] : memref<18x128xf32, #tpu.memory_space<vmem>>, vector<16x128xf32>
    tpu.vector_store %arg6[%c1_27, %c0_28], %26 {strides = array<i32>} : memref<18x128xf32, #tpu.memory_space<vmem>>, vector<16x128xf32>,
    %cst_29 = arith.constant 0.000000e+00 : f32
    %28 = vector.broadcast %cst_29 : f32 to vector<16x128xf32>
    %c0_30 = arith.constant 0 : index
    %c0_31 = arith.constant 0 : index
    %29 = vector.load %arg6[%c0_30, %c0_31] : memref<18x128xf32, #tpu.memory_space<vmem>>, vector<16x128xf32>
    %c0_32 = arith.constant 0 : index
    %c0_33 = arith.constant 0 : index
    %c0_34 = arith.constant 0 : index
    %30 = vector.load %arg3[%c0_32, %c0_33, %c0_34] : memref<3x128x128xf32, #tpu.memory_space<vmem>>, vector<1x128x128xf32>
    %31 = vector.shape_cast %30 : vector<1x128x128xf32> to vector<128x128xf32>
    %cst_35 = arith.constant dense<0.000000e+00> : vector<16x128xf32>
    %32 = tpu.matmul %29, %31, %cst_35 {dimension_numbers = #tpu.dot_dimension_numbers<[1], [0], [0], [1], [0, 0, 1, 1], [], []>} : vector<16x128xf32>, vector<128x128xf32>, vector<16x128xf32> -> vector<16x128xf32>
    %33 = arith.addf %28, %32 : vector<16x128xf32>
    %c1_36 = arith.constant 1 : index
    %c0_37 = arith.constant 0 : index
    %34 = vector.load %arg6[%c1_36, %c0_37] : memref<18x128xf32, #tpu.memory_space<vmem>>, vector<16x128xf32>
    %c1_38 = arith.constant 1 : index
    %c0_39 = arith.constant 0 : index
    %c0_40 = arith.constant 0 : index
    %35 = vector.load %arg3[%c1_38, %c0_39, %c0_40] : memref<3x128x128xf32, #tpu.memory_space<vmem>>, vector<1x128x128xf32>
    %36 = vector.shape_cast %35 : vector<1x128x128xf32> to vector<128x128xf32>
    %cst_41 = arith.constant dense<0.000000e+00> : vector<16x128xf32>
    %37 = tpu.matmul %34, %36, %cst_41 {dimension_numbers = #tpu.dot_dimension_numbers<[1], [0], [0], [1], [0, 0, 1, 1], [], []>} : vector<16x128xf32>, vector<128x128xf32>, vector<16x128xf32> -> vector<16x128xf32>
    %38 = arith.addf %33, %37 : vector<16x128xf32>
    %c2_42 = arith.constant 2 : index
    %c0_43 = arith.constant 0 : index
    %39 = vector.load %arg6[%c2_42, %c0_43] : memref<18x128xf32, #tpu.memory_space<vmem>>, vector<16x128xf32>
    %c2_44 = arith.constant 2 : index
    %c0_45 = arith.constant 0 : index
    %c0_46 = arith.constant 0 : index
    %40 = vector.load %arg3[%c2_44, %c0_45, %c0_46] : memref<3x128x128xf32, #tpu.memory_space<vmem>>, vector<1x128x128xf32>
    %41 = vector.shape_cast %40 : vector<1x128x128xf32> to vector<128x128xf32>
    %cst_47 = arith.constant dense<0.000000e+00> : vector<16x128xf32>
    %42 = tpu.matmul %39, %41, %cst_47 {dimension_numbers = #tpu.dot_dimension_numbers<[1], [0], [0], [1], [0, 0, 1, 1], [], []>} : vector<16x128xf32>, vector<128x128xf32>, vector<16x128xf32> -> vector<16x128xf32>
    %43 = arith.addf %38, %42 : vector<16x128xf32>
    %c1_48 = arith.constant 1 : index
    %c0_49 = arith.constant 0 : index
    %44 = vector.load %arg4[%c1_48, %c0_49] : memref<2x128xf32, #tpu.memory_space<vmem>>, vector<1x128xf32>
    %45 = vector.broadcast %44 : vector<1x128xf32> to vector<16x128xf32>
    %46 = arith.addf %43, %45 : vector<16x128xf32>
    %cst_50 = arith.constant 5.000000e-01 : f32
    %47 = vector.broadcast %cst_50 : f32 to vector<16x128xf32>
    %48 = arith.mulf %47, %1 : vector<16x128xf32>
    %49 = arith.addf %46, %48 : vector<16x128xf32>
    %cst_51 = arith.constant 0.000000e+00 : f32
    %50 = vector.broadcast %cst_51 : f32 to vector<16x128xf32>
    %51 = arith.maximumf %49, %50 : vector<16x128xf32>
    %c0_52 = arith.constant 0 : index
    %c0_53 = arith.constant 0 : index
    %c0_54 = arith.constant 0 : index
    %52 = vector.load %arg5[%c0_52, %c0_53, %c0_54] : memref<1x16x128xf32, #tpu.memory_space<vmem>>, vector<1x16x128xf32>
    %53 = vector.shape_cast %52 : vector<1x16x128xf32> to vector<16x128xf32>
    %54 = vector.shape_cast %51 : vector<16x128xf32> to vector<1x16x128xf32>
    tpu.vector_store %arg5[%c0_52, %c0_53, %c0_54], %54 {strides = array<i32>} : memref<1x16x128xf32, #tpu.memory_space<vmem>>, vector<1x16x128xf32>,
    return
  }
  func.func @transform_0(%arg0: i32) -> (i32, i32, i32) {
    %c0_i32 = arith.constant 0 : i32
    %c0_i32_0 = arith.constant 0 : i32
    %c0_i32_1 = arith.constant 0 : i32
    return %arg0, %c0_i32, %c0_i32_0 : i32, i32, i32
  }
  func.func @transform_1(%arg0: i32) -> (i32, i32, i32) {
    %c0_i32 = arith.constant 0 : i32
    %c0_i32_0 = arith.constant 0 : i32
    %c0_i32_1 = arith.constant 0 : i32
    %c0_i32_2 = arith.constant 0 : i32
    return %c0_i32, %c0_i32_0, %c0_i32_1 : i32, i32, i32
  }
  func.func @transform_2(%arg0: i32) -> (i32, i32, i32) {
    %c0_i32 = arith.constant 0 : i32
    %c0_i32_0 = arith.constant 0 : i32
    %c0_i32_1 = arith.constant 0 : i32
    %c0_i32_2 = arith.constant 0 : i32
    return %c0_i32, %c0_i32_0, %c0_i32_1 : i32, i32, i32
  }
  func.func @transform_3(%arg0: i32) -> (i32, i32) {
    %c0_i32 = arith.constant 0 : i32
    %c0_i32_0 = arith.constant 0 : i32
    %c0_i32_1 = arith.constant 0 : i32
    return %c0_i32, %c0_i32_0 : i32, i32
  }
  func.func @transform_4(%arg0: i32) -> (i32, i32, i32) {
    %c0_i32 = arith.constant 0 : i32
    %c0_i32_0 = arith.constant 0 : i32
    %c0_i32_1 = arith.constant 0 : i32
    return %arg0, %c0_i32, %c0_i32_0 : i32, i32, i32
  }
}

</mosaic_0001>

<bundles_post_ra>
// kernel: tile.27
= control target key start
LH: loop header
LB: loop body
LE: loop exit
PB: predicated region body
PF: predicated region fallthrough
CT: control target
= control target key end

     0   :  { %s28_s0 = inlined_call_operand.vmem [shape: f32[8], index: 0, kind: input, shape index: {}]   ;;  %s29_s1 = inlined_call_operand.vmem [shape: f32[16,8], index: 1, kind: output, shape index: {}]  }
   0x1   :  { %v4_v0 = vld [vmem:[%s28_s0] ss:$0 sm:$0xff] }
   0x2   :  { %5 = vst [vmem:[%s29_s1] sm:$0xff] %v4_v0  ;;  %8 = vst [vmem:[%s29_s1 + $0x8] sm:$0xff] %v4_v0 }

// kernel: mul.16
= control target key start
LH: loop header
LB: loop body
LE: loop exit
PB: predicated region body
PF: predicated region fallthrough
CT: control target
= control target key end

     0   :  { %s131_s10 = smov 120   ;;  %s132_s11 = smov 104   ;;  %vm3_vm0 = vcmask 64512   ;;  %vm9_vm1 = vcmask 1048512   ;;  %vm15_vm2 = vcmask 982912   ;;  %vm21_vm3 = vcmask 917312   ;;  %s207_s0 = inlined_call_operand.vmem [shape: f32[16,8], index: 0, kind: input, shape index: {}]   ;;  %s208_s1 = inlined_call_operand.vmem [shape: f32[128], index: 1, kind: output, shape index: {}]  }
   0x1   :  { %v101_v0 = vld [vmem:[%s207_s0 + $0xf] sm:$0x1]   ;;  %v103_v1 = vld [vmem:[%s207_s0 + $0xd] sm:$0x1]   ;;  %v102_v2 = vld [vmem:[%s207_s0 + $0xe] sm:$0x1]  }
   0x2   :  { %7 = vrot.lane.b32.xlu0 %v101_v0, %s131_s10  ;;  %19 = vrot.lane.b32.xlu1 %v103_v1, %s132_s11  ;;  %v104_v3 = vld [vmem:[%s207_s0 + $0xc] sm:$0x1]   ;;  %s133_s16 = smov 112   ;;  %s134_s17 = smov 96   ;;  %v105_v4 = vld [vmem:[%s207_s0 + $0xb] sm:$0x1]  }
   0x3   :  { %v106_v5 = vld [vmem:[%s207_s0 + $0xa] sm:$0x1]   ;;  %v2_v6 = vld [vmem:[%s207_s0] sm:$0x1]   ;;  %s135_s24 = smov 88   ;;  %s136_s25 = smov 80  }
   0x4   :  { %4 = vst.msk [vmem:[#allocation0] sm:$0x1] %vm3_vm0, %v2_v6   ;;  %v107_v7 = vld [vmem:[%s207_s0 + $0x9] sm:$0x1]   ;;  %v108_v8 = vld [vmem:[%s207_s0 + $0x8] sm:$0x1]  }
   0x5   :  { %s137_s30 = smov 72   ;;  %s138_s2 = smov 64   ;;  %v109_v9 = vld [vmem:[%s207_s0 + $0x7] sm:$0x1]   ;;  %v110_v10 = vld [vmem:[%s207_s0 + $0x6] sm:$0x1]  }
   0x6   :  { %13 = vrot.lane.b32.xlu0 %v102_v2, %s133_s16  ;;  %25 = vrot.lane.b32.xlu1 %v104_v3, %s134_s17  ;;  %s139_s7 = smov 56   ;;  %s140_s8 = smov 48   ;;  %v111_v11 = vld [vmem:[%s207_s0 + $0x5] sm:$0x1]   ;;  %v112_v12 = vld [vmem:[%s207_s0 + $0x4] sm:$0x1]  }
   0x7   :  { %s141_s13 = smov 40   ;;  %s142_s14 = smov 32   ;;  %v113_v13 = vld [vmem:[%s207_s0 + $0x3] sm:$0x1]   ;;  %v114_v14 = vld [vmem:[%s207_s0 + $0x2] sm:$0x1]  }
   0x8   :  { %s143_s19 = smov 24   ;;  %s144_s20 = smov 16   ;;  %v115_v15 = vld [vmem:[%s207_s0 + $0x1] sm:$0x1]   ;;  %vm27_vm4 = vcmask 851712   ;;  %vm33_vm5 = vcmask 786112  }
   0x9   :  { %s145_s0 = smov 8   ;;  %vm39_vm6 = vcmask 720512   ;;  %vm45_vm7 = vcmask 654912   ;;  %vm51_vm8 = vcmask 589312   ;;  %vm57_vm9 = vcmask 523712  }
   0xa   :  { %31 = vrot.lane.b32.xlu0 %v105_v4, %s135_s24  ;;  %37 = vrot.lane.b32.xlu1 %v106_v5, %s136_s25  ;;  %vm63_vm10 = vcmask 458112   ;;  %vm69_vm11 = vcmask 392512   ;;  %vm75_vm12 = vcmask 326912   ;;  %vm81_vm13 = vcmask 261312  }
   0xb   :  { %vm87_vm14 = vcmask 195712   ;;  %vm93_vm15 = vcmask 130112  }
   0xe   :  { %43 = vrot.lane.b32.xlu0 %v107_v7, %s137_s30  ;;  %49 = vrot.lane.b32.xlu1 %v108_v8, %s138_s2 }
  0x12   :  { %55 = vrot.lane.b32.xlu0 %v109_v9, %s139_s7  ;;  %61 = vrot.lane.b32.xlu1 %v110_v10, %s140_s8 }
  0x16   :  { %67 = vrot.lane.b32.xlu0 %v111_v11, %s141_s13  ;;  %73 = vrot.lane.b32.xlu1 %v112_v12, %s142_s14 }
  0x1a   :  { %79 = vrot.lane.b32.xlu0 %v113_v13, %s143_s19  ;;  %85 = vrot.lane.b32.xlu1 %v114_v14, %s144_s20 }
  0x1e   :  { %91 = vrot.lane.b32.xlu0 %v115_v15, %s145_s0 }
  0x74   :  { %v8_v16 = vpop.permute.xlu0 %7   ;;  %v20_v17 = vpop.permute.xlu1 %19  }
  0x75   :  { %10 = vst.msk [vmem:[#allocation0] sm:$0x1] %vm9_vm1, %v8_v16  }
  0x78   :  { %v14_v18 = vpop.permute.xlu0 %13   ;;  %v26_v19 = vpop.permute.xlu1 %25  }
  0x79   :  { %16 = vst.msk [vmem:[#allocation0] sm:$0x1] %vm15_vm2, %v14_v18  }
  0x7a   :  { %22 = vst.msk [vmem:[#allocation0] sm:$0x1] %vm21_vm3, %v20_v17  }
  0x7b   :  { %28 = vst.msk [vmem:[#allocation0] sm:$0x1] %vm27_vm4, %v26_v19  }
  0x7c   :  { %v32_v20 = vpop.permute.xlu0 %31   ;;  %v38_v21 = vpop.permute.xlu1 %37  }
  0x7d   :  { %34 = vst.msk [vmem:[#allocation0] sm:$0x1] %vm33_vm5, %v32_v20  }
  0x7e   :  { %40 = vst.msk [vmem:[#allocation0] sm:$0x1] %vm39_vm6, %v38_v21  }
  0x80   :  { %v44_v22 = vpop.permute.xlu0 %43   ;;  %v50_v23 = vpop.permute.xlu1 %49  }
  0x81   :  { %46 = vst.msk [vmem:[#allocation0] sm:$0x1] %vm45_vm7, %v44_v22  }
  0x82   :  { %52 = vst.msk [vmem:[#allocation0] sm:$0x1] %vm51_vm8, %v50_v23  }
  0x84   :  { %v56_v24 = vpop.permute.xlu0 %55   ;;  %v62_v25 = vpop.permute.xlu1 %61  }
  0x85   :  { %58 = vst.msk [vmem:[#allocation0] sm:$0x1] %vm57_vm9, %v56_v24  }
  0x86   :  { %64 = vst.msk [vmem:[#allocation0] sm:$0x1] %vm63_vm10, %v62_v25  }
  0x88   :  { %v68_v26 = vpop.permute.xlu0 %67   ;;  %v74_v27 = vpop.permute.xlu1 %73  }
  0x89   :  { %70 = vst.msk [vmem:[#allocation0] sm:$0x1] %vm69_vm11, %v68_v26  }
  0x8a   :  { %76 = vst.msk [vmem:[#allocation0] sm:$0x1] %vm75_vm12, %v74_v27  }
  0x8c   :  { %v80_v28 = vpop.permute.xlu0 %79   ;;  %v86_v29 = vpop.permute.xlu1 %85  }
  0x8d   :  { %82 = vst.msk [vmem:[#allocation0] sm:$0x1] %vm81_vm13, %v80_v28  }
  0x8e   :  { %88 = vst.msk [vmem:[#allocation0] sm:$0x1] %vm87_vm14, %v86_v29  }
  0x90   :  { %v92_v30 = vpop.permute.xlu0 %91  }
  0x91   :  { %94 = vst.msk [vmem:[#allocation0] sm:$0x1] %vm93_vm15, %v92_v30  }
  0x98   :  { %v98_v31 = vld [vmem:[#allocation0] sm:$0x1] }
  0x99   :  { %100 = vst [vmem:[%s208_s1] sm:$0x1] %v98_v31 }

// kernel: tile.39
= control target key start
LH: loop header
LB: loop body
LE: loop exit
PB: predicated region body
PF: predicated region fallthrough
CT: control target
= control target key end

     0   :  { %s131_s10 = smov 120   ;;  %s132_s11 = smov 104   ;;  %vm3_vm0 = vcmask 64512   ;;  %vm9_vm1 = vcmask 1048512   ;;  %vm15_vm2 = vcmask 982912   ;;  %vm21_vm3 = vcmask 917312   ;;  %s207_s0 = inlined_call_operand.vmem [shape: f32[16,8], index: 0, kind: input, shape index: {}]   ;;  %s208_s1 = inlined_call_operand.vmem [shape: f32[1,128], index: 1, kind: output, shape index: {}]  }
   0x1   :  { %v101_v0 = vld [vmem:[%s207_s0 + $0xf] sm:$0x1]   ;;  %v103_v1 = vld [vmem:[%s207_s0 + $0xd] sm:$0x1]   ;;  %v102_v2 = vld [vmem:[%s207_s0 + $0xe] sm:$0x1]  }
   0x2   :  { %7 = vrot.lane.b32.xlu0 %v101_v0, %s131_s10  ;;  %19 = vrot.lane.b32.xlu1 %v103_v1, %s132_s11  ;;  %v104_v3 = vld [vmem:[%s207_s0 + $0xc] sm:$0x1]   ;;  %s133_s16 = smov 112   ;;  %s134_s17 = smov 96   ;;  %v105_v4 = vld [vmem:[%s207_s0 + $0xb] sm:$0x1]  }
   0x3   :  { %v106_v5 = vld [vmem:[%s207_s0 + $0xa] sm:$0x1]   ;;  %v2_v6 = vld [vmem:[%s207_s0] sm:$0x1]   ;;  %s135_s24 = smov 88   ;;  %s136_s25 = smov 80  }
   0x4   :  { %4 = vst.msk [vmem:[#allocation0] sm:$0x1] %vm3_vm0, %v2_v6   ;;  %v107_v7 = vld [vmem:[%s207_s0 + $0x9] sm:$0x1]   ;;  %v108_v8 = vld [vmem:[%s207_s0 + $0x8] sm:$0x1]  }
   0x5   :  { %s137_s30 = smov 72   ;;  %s138_s2 = smov 64   ;;  %v109_v9 = vld [vmem:[%s207_s0 + $0x7] sm:$0x1]   ;;  %v110_v10 = vld [vmem:[%s207_s0 + $0x6] sm:$0x1]  }
   0x6   :  { %13 = vrot.lane.b32.xlu0 %v102_v2, %s133_s16  ;;  %25 = vrot.lane.b32.xlu1 %v104_v3, %s134_s17  ;;  %s139_s7 = smov 56   ;;  %s140_s8 = smov 48   ;;  %v111_v11 = vld [vmem:[%s207_s0 + $0x5] sm:$0x1]   ;;  %v112_v12 = vld [vmem:[%s207_s0 + $0x4] sm:$0x1]  }
   0x7   :  { %s141_s13 = smov 40   ;;  %s142_s14 = smov 32   ;;  %v113_v13 = vld [vmem:[%s207_s0 + $0x3] sm:$0x1]   ;;  %v114_v14 = vld [vmem:[%s207_s0 + $0x2] sm:$0x1]  }
   0x8   :  { %s143_s19 = smov 24   ;;  %s144_s20 = smov 16   ;;  %v115_v15 = vld [vmem:[%s207_s0 + $0x1] sm:$0x1]   ;;  %vm27_vm4 = vcmask 851712   ;;  %vm33_vm5 = vcmask 786112  }
   0x9   :  { %s145_s0 = smov 8   ;;  %vm39_vm6 = vcmask 720512   ;;  %vm45_vm7 = vcmask 654912   ;;  %vm51_vm8 = vcmask 589312   ;;  %vm57_vm9 = vcmask 523712  }
   0xa   :  { %31 = vrot.lane.b32.xlu0 %v105_v4, %s135_s24  ;;  %37 = vrot.lane.b32.xlu1 %v106_v5, %s136_s25  ;;  %vm63_vm10 = vcmask 458112   ;;  %vm69_vm11 = vcmask 392512   ;;  %vm75_vm12 = vcmask 326912   ;;  %vm81_vm13 = vcmask 261312  }
   0xb   :  { %vm87_vm14 = vcmask 195712   ;;  %vm93_vm15 = vcmask 130112  }
   0xe   :  { %43 = vrot.lane.b32.xlu0 %v107_v7, %s137_s30  ;;  %49 = vrot.lane.b32.xlu1 %v108_v8, %s138_s2 }
  0x12   :  { %55 = vrot.lane.b32.xlu0 %v109_v9, %s139_s7  ;;  %61 = vrot.lane.b32.xlu1 %v110_v10, %s140_s8 }
  0x16   :  { %67 = vrot.lane.b32.xlu0 %v111_v11, %s141_s13  ;;  %73 = vrot.lane.b32.xlu1 %v112_v12, %s142_s14 }
  0x1a   :  { %79 = vrot.lane.b32.xlu0 %v113_v13, %s143_s19  ;;  %85 = vrot.lane.b32.xlu1 %v114_v14, %s144_s20 }
  0x1e   :  { %91 = vrot.lane.b32.xlu0 %v115_v15, %s145_s0 }
  0x74   :  { %v8_v16 = vpop.permute.xlu0 %7   ;;  %v20_v17 = vpop.permute.xlu1 %19  }
  0x75   :  { %10 = vst.msk [vmem:[#allocation0] sm:$0x1] %vm9_vm1, %v8_v16  }
  0x78   :  { %v14_v18 = vpop.permute.xlu0 %13   ;;  %v26_v19 = vpop.permute.xlu1 %25  }
  0x79   :  { %16 = vst.msk [vmem:[#allocation0] sm:$0x1] %vm15_vm2, %v14_v18  }
  0x7a   :  { %22 = vst.msk [vmem:[#allocation0] sm:$0x1] %vm21_vm3, %v20_v17  }
  0x7b   :  { %28 = vst.msk [vmem:[#allocation0] sm:$0x1] %vm27_vm4, %v26_v19  }
  0x7c   :  { %v32_v20 = vpop.permute.xlu0 %31   ;;  %v38_v21 = vpop.permute.xlu1 %37  }
  0x7d   :  { %34 = vst.msk [vmem:[#allocation0] sm:$0x1] %vm33_vm5, %v32_v20  }
  0x7e   :  { %40 = vst.msk [vmem:[#allocation0] sm:$0x1] %vm39_vm6, %v38_v21  }
  0x80   :  { %v44_v22 = vpop.permute.xlu0 %43   ;;  %v50_v23 = vpop.permute.xlu1 %49  }
  0x81   :  { %46 = vst.msk [vmem:[#allocation0] sm:$0x1] %vm45_vm7, %v44_v22  }
  0x82   :  { %52 = vst.msk [vmem:[#allocation0] sm:$0x1] %vm51_vm8, %v50_v23  }
  0x84   :  { %v56_v24 = vpop.permute.xlu0 %55   ;;  %v62_v25 = vpop.permute.xlu1 %61  }
  0x85   :  { %58 = vst.msk [vmem:[#allocation0] sm:$0x1] %vm57_vm9, %v56_v24  }
  0x86   :  { %64 = vst.msk [vmem:[#allocation0] sm:$0x1] %vm63_vm10, %v62_v25  }
  0x88   :  { %v68_v26 = vpop.permute.xlu0 %67   ;;  %v74_v27 = vpop.permute.xlu1 %73  }
  0x89   :  { %70 = vst.msk [vmem:[#allocation0] sm:$0x1] %vm69_vm11, %v68_v26  }
  0x8a   :  { %76 = vst.msk [vmem:[#allocation0] sm:$0x1] %vm75_vm12, %v74_v27  }
  0x8c   :  { %v80_v28 = vpop.permute.xlu0 %79   ;;  %v86_v29 = vpop.permute.xlu1 %85  }
  0x8d   :  { %82 = vst.msk [vmem:[#allocation0] sm:$0x1] %vm81_vm13, %v80_v28  }
  0x8e   :  { %88 = vst.msk [vmem:[#allocation0] sm:$0x1] %vm87_vm14, %v86_v29  }
  0x90   :  { %v92_v30 = vpop.permute.xlu0 %91  }
  0x91   :  { %94 = vst.msk [vmem:[#allocation0] sm:$0x1] %vm93_vm15, %v92_v30  }
  0x98   :  { %v98_v31 = vld [vmem:[#allocation0] sm:$0x1] }
  0x99   :  { %100 = vst [vmem:[%s208_s1] sm:$0x1] %v98_v31 }

// kernel: basic_block_forward_nhwc.1
= control target key start
LH: loop header
LB: loop body
LE: loop exit
PB: predicated region body
PF: predicated region fallthrough
CT: control target
= control target key end

     0   :  { %s1491_s15 = smov 0   ;;  %s1819_s0 = inlined_call_operand.vmem [shape: f32[2,16,128], index: 0, kind: input, shape index: {}]   ;;  %s1820_s1 = inlined_call_operand.vmem [shape: f32[3,128,128], index: 1, kind: input, shape index: {}]   ;;  %s1821_s2 = inlined_call_operand.vmem [shape: f32[3,128,128], index: 2, kind: input, shape index: {}]   ;;  %s1822_s3 = inlined_call_operand.vmem [shape: f32[2,128], index: 3, kind: input, shape index: {}]   ;;  %s1823_s4 = inlined_call_operand.vmem [shape: f32[2,16,128], index: 4, kind: output, shape index: {}]  }
   0x1 LB: > { %s851_s16 = sadd.s32 4294967295, %s1463_s15   ;;  %p855_p0 = scmp.ge.s32.totalorder %s1463_s15, 1  ;;  %s1463_s15 = sphi %s1491_s15, %s14_s15  }
   0x2   : > { %p162_p1 = scmp.lt.s32.totalorder %s1463_s15, 3 }
   0x4   : > { %p163_p2 = pnand %p855_p0, %p162_p1 }
   0x5   : > { %v860_v0 = vld [vmem:[%s1820_s1 + $0x80] sm:$0xff] (!%p163_p2)  ;;  %v861_v1 = vld [vmem:[%s1820_s1 + $0x88] sm:$0xff] (!%p163_p2)  ;;  %v862_v2 = vld [vmem:[%s1820_s1 + $0x90] sm:$0xff] (!%p163_p2)  ;;  %p188_p3 = scmp.lt.s32.totalorder (!%p163_p2), %s851_s16, 1  ;;  %v1465_v5 = vmov (!%p163_p2), 0.0  }
   0x6   : > { %166 = sbr.rel (%p163_p2) target bundleno = 606 (0x25e), region = 36  ;;  %v1248_v3 = vpack.c.bf16 (!%p163_p2), %v861_v1, %v860_v0  ;;  %v863_v4 = vld [vmem:[%s1820_s1 + $0x98] sm:$0xff] (!%p163_p2)  ;;  %200 = vst [vmem:[#allocation2] sm:$0x1] (!%p163_p2), %v1465_v5  ;;  %201 = vst [vmem:[#allocation2 + $0x11] sm:$0x1] (!%p163_p2), %v1465_v5 }
   0x7   : > { %v1252_v6 = vpack.c.bf16 (!%p163_p2), %v863_v4, %v862_v2  ;;  %v864_v7 = vld [vmem:[%s1820_s1 + $0xa0] sm:$0xff] (!%p163_p2)  ;;  %v865_v8 = vld [vmem:[%s1820_s1 + $0xa8] sm:$0xff] (!%p163_p2)  ;;  %v866_v10 = vld [vmem:[%s1820_s1 + $0xb0] sm:$0xff] (!%p163_p2) }
   0x8   : > { %1249 = vmatprep.subr.bf16.mxu0 (!%p163_p2), %v1248_v3  ;;  %v1256_v9 = vpack.c.bf16 (!%p163_p2), %v865_v8, %v864_v7  ;;  %v867_v11 = vld [vmem:[%s1820_s1 + $0xb8] sm:$0xff] (!%p163_p2)  ;;  %v868_v15 = vld [vmem:[%s1820_s1 + $0xc0] sm:$0xff] (!%p163_p2)  ;;  %v869_v16 = vld [vmem:[%s1820_s1 + $0xc8] sm:$0xff] (!%p163_p2) }
   0x9   : > { %1251 = vmatpush3.bf16.msra.mxu0 (!%p163_p2), %v1248_v3  ;;  %v1260_v14 = vpack.c.bf16 (!%p163_p2), %v867_v11, %v866_v10  ;;  %v1264_v17 = vpack.c.bf16 (!%p163_p2), %v869_v16, %v868_v15  ;;  %v870_v18 = vld [vmem:[%s1820_s1 + $0xd0] sm:$0xff] (!%p163_p2)  ;;  %v871_v19 = vld [vmem:[%s1820_s1 + $0xd8] sm:$0xff] (!%p163_p2)  ;;  %v872_v21 = vld [vmem:[%s1820_s1 + $0xe0] sm:$0xff] (!%p163_p2) }
   0xa   : > { %1253 = vmatprep.subr.bf16.mxu0 (!%p163_p2), %v1252_v6  ;;  %v1268_v20 = vpack.c.bf16 (!%p163_p2), %v871_v19, %v870_v18  ;;  %v873_v22 = vld [vmem:[%s1820_s1 + $0xe8] sm:$0xff] (!%p163_p2)  ;;  %v893_v23 = vld [vmem:[%s1821_s2 + $0x80] sm:$0xff] (!%p163_p2)  ;;  %v895_v25 = vld [vmem:[%s1821_s2 + $0x90] sm:$0xff] (!%p163_p2) }
   0xb   : > { %v894_v24 = vld [vmem:[%s1821_s2 + $0x88] sm:$0xff] (!%p163_p2)  ;;  %v896_v27 = vld [vmem:[%s1821_s2 + $0x98] sm:$0xff] (!%p163_p2)  ;;  %v897_v29 = vld [vmem:[%s1821_s2 + $0xa0] sm:$0xff] (!%p163_p2)  ;;  %v1272_v31 = vpack.c.bf16 (!%p163_p2), %v873_v22, %v872_v21 }
   0xc   : > { %v1344_v26 = vpack.c.bf16 (!%p163_p2), %v894_v24, %v893_v23  ;;  %v1348_v28 = vpack.c.bf16 (!%p163_p2), %v896_v27, %v895_v25  ;;  %v898_v30 = vld [vmem:[%s1821_s2 + $0xa8] sm:$0xff] (!%p163_p2)  ;;  %v874_v32 = vld [vmem:[%s1820_s1 + $0xf0] sm:$0xff] (!%p163_p2)  ;;  %v875_v33 = vld [vmem:[%s1820_s1 + $0xf8] sm:$0xff] (!%p163_p2) }
   0xd   : > { %s1825_s16 = smov (!%p188_p3, %s851_s16), 1  ;;  %1255 = vmatpush3.bf16.msra.mxu0 %v1252_v6  ;;  %v1352_v34 = vpack.c.bf16 %v898_v30, %v897_v29  ;;  %v899_v35 = vld [vmem:[%s1821_s2 + $0xb0] sm:$0xff]  ;;  %v900_v36 = vld [vmem:[%s1821_s2 + $0xb8] sm:$0xff]  ;;  %v1276_v37 = vpack.c.bf16 %v875_v33, %v874_v32  ;;  %v206_v38 = vld [vmem:[%s1820_s1] sm:$0xff] }
   0xe   : > { %s928_s29 = sshll.u32 %s1825_s16, 4  ;;  %1257 = vmatprep.subr.bf16.mxu0 %v1256_v9  ;;  %1345 = vmatprep.subr.bf16.mxu1 %v1344_v26  ;;  %v207_v39 = vld [vmem:[%s1820_s1 + $0x8] sm:$0xff]  ;;  %v1356_v40 = vpack.c.bf16 %v900_v36, %v899_v35  ;;  %v901_v41 = vld [vmem:[%s1821_s2 + $0xc0] sm:$0xff]  ;;  %v208_v44 = vld [vmem:[%s1820_s1 + $0x10] sm:$0xff] }
   0xf   : > { %s192_s8 = scalar_lea.vmem %s1819_s0, %s928_s29  ;;  %1347 = vmatpush3.bf16.msra.mxu1 %v1344_v26  ;;  %v902_v42 = vld [vmem:[%s1821_s2 + $0xc8] sm:$0xff]  ;;  %v1280_v43 = vpack.c.bf16 %v207_v39, %v206_v38  ;;  %v209_v45 = vld [vmem:[%s1820_s1 + $0x18] sm:$0xff]  ;;  %v210_v49 = vld [vmem:[%s1820_s1 + $0x20] sm:$0xff]  ;;  %s197_s9 = scalar_lea.vmem %s1823_s4, %s928_s29 }
  0x10   : > { %v1531_v12 = vld [vmem:[%s192_s8] sm:$0xff]  ;;  %v1533_v13 = vld [vmem:[%s192_s8 + $0x8] sm:$0xff]  ;;  %1349 = vmatprep.subr.bf16.mxu1 %v1348_v28  ;;  %v1360_v46 = vpack.c.bf16 %v902_v42, %v901_v41  ;;  %v1284_v47 = vpack.c.bf16 %v209_v45, %v208_v44  ;;  %v212_v52 = vld [vmem:[%s1820_s1 + $0x30] sm:$0xff] }
  0x11   : > { %202 = vst [vmem:[#allocation2 + $0x1] sm:$0xff] %v1531_v12  ;;  %1070 = vmatprep.mubr.f32.mxu0 %v1531_v12  ;;  %203 = vst [vmem:[#allocation2 + $0x9] sm:$0xff] %v1533_v13  ;;  %1259 = vmatpush3.bf16.msra.mxu0 %v1256_v9  ;;  %v211_v50 = vld [vmem:[%s1820_s1 + $0x28] sm:$0xff]  ;;  %v213_v53 = vld [vmem:[%s1820_s1 + $0x38] sm:$0xff] }
  0x12   : > { %1261 = vmatprep.subr.bf16.mxu0 %v1260_v14  ;;  %v1288_v51 = vpack.c.bf16 %v211_v50, %v210_v49  ;;  %v1292_v54 = vpack.c.bf16 %v213_v53, %v212_v52  ;;  %v214_v55 = vld [vmem:[%s1820_s1 + $0x40] sm:$0xff]  ;;  %v215_v56 = vld [vmem:[%s1820_s1 + $0x48] sm:$0xff]  ;;  %v216_v58 = vld [vmem:[%s1820_s1 + $0x50] sm:$0xff] }
  0x13   : > { %1351 = vmatpush3.bf16.msra.mxu1 %v1348_v28  ;;  %v1296_v57 = vpack.c.bf16 %v215_v56, %v214_v55  ;;  %v217_v59 = vld [vmem:[%s1820_s1 + $0x58] sm:$0xff]  ;;  %v218_v61 = vld [vmem:[%s1820_s1 + $0x60] sm:$0xff]  ;;  %v219_v62 = vld [vmem:[%s1820_s1 + $0x68] sm:$0xff] }
  0x14   : > { %1353 = vmatprep.subr.bf16.mxu1 %v1352_v34  ;;  %v1300_v60 = vpack.c.bf16 %v217_v59, %v216_v58  ;;  %v1304_v63 = vpack.c.bf16 %v219_v62, %v218_v61  ;;  %v220_v0 = vld [vmem:[%s1820_s1 + $0x70] sm:$0xff]  ;;  %v221_v1 = vld [vmem:[%s1820_s1 + $0x78] sm:$0xff]  ;;  %v876_v3 = vld [vmem:[%s1820_s1 + $0x100] sm:$0xff] }
  0x15   : > { %1263 = vmatpush3.bf16.msra.mxu0 %v1260_v14  ;;  %v1308_v2 = vpack.c.bf16 %v221_v1, %v220_v0  ;;  %v877_v4 = vld [vmem:[%s1820_s1 + $0x108] sm:$0xff]  ;;  %v878_v6 = vld [vmem:[%s1820_s1 + $0x110] sm:$0xff]  ;;  %v879_v7 = vld [vmem:[%s1820_s1 + $0x118] sm:$0xff] }
  0x16   : > { %1265 = vmatprep.subr.bf16.mxu0 %v1264_v17  ;;  %v1312_v5 = vpack.c.bf16 %v877_v4, %v876_v3  ;;  %v1316_v9 = vpack.c.bf16 %v879_v7, %v878_v6  ;;  %v880_v11 = vld [vmem:[%s1820_s1 + $0x120] sm:$0xff]  ;;  %v881_v14 = vld [vmem:[%s1820_s1 + $0x128] sm:$0xff]  ;;  %v882_v16 = vld [vmem:[%s1820_s1 + $0x130] sm:$0xff] }
  0x17   : > { %1355 = vmatpush3.bf16.msra.mxu1 %v1352_v34  ;;  %v1320_v15 = vpack.c.bf16 %v881_v14, %v880_v11  ;;  %v884_v19 = vld [vmem:[%s1820_s1 + $0x140] sm:$0xff]  ;;  %v886_v22 = vld [vmem:[%s1820_s1 + $0x150] sm:$0xff]  ;;  %v887_v23 = vld [vmem:[%s1820_s1 + $0x158] sm:$0xff] }
  0x18   : > { %1357 = vmatprep.subr.bf16.mxu1 %v1356_v40  ;;  %v204_v48 = vld [vmem:[#allocation2] sm:$0xff]  ;;  %v205_v8 = vld [vmem:[#allocation2 + $0x8] sm:$0xff]  ;;  %v1332_v24 = vpack.c.bf16 %v887_v23, %v886_v22  ;;  %v890_v28 = vld [vmem:[%s1820_s1 + $0x170] sm:$0xff] }
  0x19   : > { %1267 = vmatpush3.bf16.msra.mxu0 %v1264_v17  ;;  %v391_v10 = vld [vmem:[#allocation2 + $0x2] sm:$0xff]  ;;  %v883_v17 = vld [vmem:[%s1820_s1 + $0x138] sm:$0xff]  ;;  %v903_v32 = vld [vmem:[%s1821_s2 + $0xd0] sm:$0xff] }
  0x1a   : > { %1269 = vmatprep.subr.bf16.mxu0 %v1268_v20  ;;  %v1324_v18 = vpack.c.bf16 %v883_v17, %v882_v16  ;;  %v888_v25 = vld [vmem:[%s1820_s1 + $0x160] sm:$0xff]  ;;  %v889_v26 = vld [vmem:[%s1820_s1 + $0x168] sm:$0xff]  ;;  %v891_v29 = vld [vmem:[%s1820_s1 + $0x178] sm:$0xff] }
  0x1b   : > { %1359 = vmatpush3.bf16.msra.mxu1 %v1356_v40  ;;  %v1336_v27 = vpack.c.bf16 %v889_v26, %v888_v25  ;;  %v1340_v30 = vpack.c.bf16 %v891_v29, %v890_v28  ;;  %v904_v33 = vld [vmem:[%s1821_s2 + $0xd8] sm:$0xff]  ;;  %v905_v35 = vld [vmem:[%s1821_s2 + $0xe0] sm:$0xff]  ;;  %v906_v36 = vld [vmem:[%s1821_s2 + $0xe8] sm:$0xff] }
  0x1c   : > { %1361 = vmatprep.subr.bf16.mxu1 %v1360_v46  ;;  %v1364_v34 = vpack.c.bf16 %v904_v33, %v903_v32  ;;  %v907_v38 = vld [vmem:[%s1821_s2 + $0xf0] sm:$0xff]  ;;  %v908_v39 = vld [vmem:[%s1821_s2 + $0xf8] sm:$0xff]  ;;  %v500_v41 = vld [vmem:[%s1821_s2] sm:$0xff] }
  0x1d   : > { %1271 = vmatpush3.bf16.msra.mxu0 %v1268_v20  ;;  %v885_v20 = vld [vmem:[%s1820_s1 + $0x148] sm:$0xff]  ;;  %v1372_v40 = vpack.c.bf16 %v908_v39, %v907_v38  ;;  %v892_v44 = vld [vmem:[%s1822_s3] ss:$0 sm:$0xff]  ;;  %v502_v49 = vld [vmem:[%s1821_s2 + $0x10] sm:$0xff]  ;;  %v789_v39 = vmul.f32 0.5, %v1533_v13 }
  0x1e   : > { %1273 = vmatprep.subr.bf16.mxu0 %v1272_v31  ;;  %v1328_v21 = vpack.c.bf16 %v885_v20, %v884_v19  ;;  %v501_v42 = vld [vmem:[%s1821_s2 + $0x8] sm:$0xff]  ;;  %v503_v50 = vld [vmem:[%s1821_s2 + $0x18] sm:$0xff]  ;;  %v508_v61 = vld [vmem:[%s1821_s2 + $0x40] sm:$0xff] }
  0x1f   : > { %1363 = vmatpush3.bf16.msra.mxu1 %v1360_v46  ;;  %v1380_v53 = vpack.c.bf16 %v503_v50, %v502_v49  ;;  %v505_v55 = vld [vmem:[%s1821_s2 + $0x28] sm:$0xff]  ;;  %v507_v58 = vld [vmem:[%s1821_s2 + $0x38] sm:$0xff]  ;;  %v510_v0 = vld [vmem:[%s1821_s2 + $0x50] sm:$0xff] }
  0x20   : > { %1365 = vmatprep.subr.bf16.mxu1 %v1364_v34  ;;  %v509_v62 = vld [vmem:[%s1821_s2 + $0x48] sm:$0xff]  ;;  %v511_v1 = vld [vmem:[%s1821_s2 + $0x58] sm:$0xff]  ;;  %v512_v3 = vld [vmem:[%s1821_s2 + $0x60] sm:$0xff] }
  0x21   : > { %1275 = vmatpush3.bf16.msra.mxu0 %v1272_v31  ;;  %v392_v31 = vld [vmem:[#allocation2 + $0xa] sm:$0xff]  ;;  %v515_v7 = vld [vmem:[%s1821_s2 + $0x78] sm:$0xff]  ;;  %v917_v25 = vld [vmem:[%s1821_s2 + $0x140] sm:$0xff] }
  0x22   : > { %1277 = vmatprep.subr.bf16.mxu0 %v1276_v37  ;;  %v513_v4 = vld [vmem:[%s1821_s2 + $0x68] sm:$0xff]  ;;  %v514_v6 = vld [vmem:[%s1821_s2 + $0x70] sm:$0xff]  ;;  %v916_v23 = vld [vmem:[%s1821_s2 + $0x138] sm:$0xff] }
  0x23   : > { %1367 = vmatpush3.bf16.msra.mxu1 %v1364_v34  ;;  %v911_v14 = vld [vmem:[%s1821_s2 + $0x110] sm:$0xff]  ;;  %v914_v19 = vld [vmem:[%s1821_s2 + $0x128] sm:$0xff]  ;;  %v920_v29 = vld [vmem:[%s1821_s2 + $0x158] sm:$0xff] }
  0x24   : > { %v915_v22 = vld [vmem:[%s1821_s2 + $0x130] sm:$0xff]  ;;  %v918_v26 = vld [vmem:[%s1821_s2 + $0x148] sm:$0xff]  ;;  %v925_v38 = vld [vmem:[%s1822_s3 + $0x1] ss:$0 sm:$0xff] }
  0x25   : > { %1279 = vmatpush3.bf16.msra.mxu0 %v1276_v37  ;;  %v1368_v37 = vpack.c.bf16 %v906_v36, %v905_v35  ;;  %v919_v28 = vld [vmem:[%s1821_s2 + $0x150] sm:$0xff]  ;;  %v922_v32 = vld [vmem:[%s1821_s2 + $0x168] sm:$0xff]  ;;  %v924_v35 = vld [vmem:[%s1821_s2 + $0x178] sm:$0xff] }
  0x26   : > { %1281 = vmatprep.subr.bf16.mxu0 %v1280_v43  ;;  %v923_v34 = vld [vmem:[%s1821_s2 + $0x170] sm:$0xff] }
  0x27   : > { %1369 = vmatprep.subr.bf16.mxu1 %v1368_v37  ;;  %v1436_v36 = vpack.c.bf16 %v924_v35, %v923_v34 }
  0x28   : > { %1071 = vmatmul.mubr.f32.vlgmr.msra.gmra.mrb[0].mxu0 %v1533_v13  ;;  %1371 = vmatpush3.bf16.msra.mxu1 %v1368_v37 }
  0x29   : > { %1283 = vmatpush3.bf16.msra.mxu0 %v1280_v43  ;;  %1105 = vmatprep.mubr.f32.mxu0 %v204_v48  ;;  %v1376_v43 = vpack.c.bf16 %v501_v42, %v500_v41  ;;  %v788_v41 = vmul.f32 0.5, %v1531_v12 }
  0x2a   : > { %1285 = vmatprep.subr.bf16.mxu0 %v1284_v47  ;;  %1373 = vmatprep.subr.bf16.mxu1 %v1372_v40 }
  0x2c   : > { %1375 = vmatpush3.bf16.msra.mxu1 %v1372_v40 }
  0x2d   : > { %1287 = vmatpush3.bf16.msra.mxu0 %v1284_v47  ;;  %1377 = vmatprep.subr.bf16.mxu1 %v1376_v43 }
  0x2e   : > { %1289 = vmatprep.subr.bf16.mxu0 %v1288_v51 }
  0x31   : > { %1291 = vmatpush3.bf16.msra.mxu0 %v1288_v51 }
  0x32   : > { %1293 = vmatprep.subr.bf16.mxu0 %v1292_v54 }
  0x35   : > { %1295 = vmatpush3.bf16.msra.mxu0 %v1292_v54  ;;  %v504_v54 = vld [vmem:[%s1821_s2 + $0x20] sm:$0xff] }
  0x36   : > { %1297 = vmatprep.subr.bf16.mxu0 %v1296_v57  ;;  %v1384_v56 = vpack.c.bf16 %v505_v55, %v504_v54 }
  0x39   : > { %1299 = vmatpush3.bf16.msra.mxu0 %v1296_v57  ;;  %v506_v57 = vld [vmem:[%s1821_s2 + $0x30] sm:$0xff] }
  0x3a   : > { %1301 = vmatprep.subr.bf16.mxu0 %v1300_v60 }
  0x3d   : > { %1303 = vmatpush3.bf16.msra.mxu0 %v1300_v60  ;;  %v1388_v60 = vpack.c.bf16 %v507_v58, %v506_v57 }
  0x3e   : > { %1305 = vmatprep.subr.bf16.mxu0 %v1304_v63 }
  0x41   : > { %1307 = vmatpush3.bf16.msra.mxu0 %v1304_v63  ;;  %v1392_v63 = vpack.c.bf16 %v509_v62, %v508_v61 }
  0x42   : > { %1309 = vmatprep.subr.bf16.mxu0 %v1308_v2 }
  0x45   : > { %1311 = vmatpush3.bf16.msra.mxu0 %v1308_v2  ;;  %v1396_v2 = vpack.c.bf16 %v511_v1, %v510_v0 }
  0x46   : > { %1313 = vmatprep.subr.bf16.mxu0 %v1312_v5 }
  0x48   : > { %1106 = vmatmul.mubr.f32.vlgmr.msra.gmra.mrb[0].mxu0 %v205_v8  ;;  %v1404_v8 = vpack.c.bf16 %v515_v7, %v514_v6 }
  0x49   : > { %1315 = vmatpush3.bf16.msra.mxu0 %v1312_v5  ;;  %1140 = vmatprep.mubr.f32.mxu0 %v391_v10  ;;  %v1400_v5 = vpack.c.bf16 %v513_v4, %v512_v3  ;;  %v910_v10 = vld [vmem:[%s1821_s2 + $0x108] sm:$0xff] }
  0x4a   : > { %1317 = vmatprep.subr.bf16.mxu0 %v1316_v9 }
  0x4d   : > { %1319 = vmatpush3.bf16.msra.mxu0 %v1316_v9  ;;  %v909_v9 = vld [vmem:[%s1821_s2 + $0x100] sm:$0xff] }
  0x4e   : > { %1321 = vmatprep.subr.bf16.mxu0 %v1320_v15  ;;  %v1408_v11 = vpack.c.bf16 %v910_v10, %v909_v9 }
  0x51   : > { %1323 = vmatpush3.bf16.msra.mxu0 %v1320_v15  ;;  %v912_v15 = vld [vmem:[%s1821_s2 + $0x118] sm:$0xff] }
  0x52   : > { %1325 = vmatprep.subr.bf16.mxu0 %v1324_v18  ;;  %v1412_v16 = vpack.c.bf16 %v912_v15, %v911_v14 }
  0x55   : > { %1327 = vmatpush3.bf16.msra.mxu0 %v1324_v18  ;;  %v913_v18 = vld [vmem:[%s1821_s2 + $0x120] sm:$0xff] }
  0x56   : > { %1329 = vmatprep.subr.bf16.mxu0 %v1328_v21 }
  0x59   : > { %1331 = vmatpush3.bf16.msra.mxu0 %v1328_v21  ;;  %v1416_v21 = vpack.c.bf16 %v914_v19, %v913_v18 }
  0x5a   : > { %1333 = vmatprep.subr.bf16.mxu0 %v1332_v24 }
  0x5d   : > { %1335 = vmatpush3.bf16.msra.mxu0 %v1332_v24  ;;  %v1420_v24 = vpack.c.bf16 %v916_v23, %v915_v22 }
  0x5e   : > { %1337 = vmatprep.subr.bf16.mxu0 %v1336_v27 }
  0x61   : > { %1339 = vmatpush3.bf16.msra.mxu0 %v1336_v27  ;;  %v1424_v27 = vpack.c.bf16 %v918_v26, %v917_v25 }
  0x62   : > { %1341 = vmatprep.subr.bf16.mxu0 %v1340_v30 }
  0x65   : > { %1343 = vmatpush3.bf16.msra.mxu0 %v1340_v30  ;;  %v1428_v30 = vpack.c.bf16 %v920_v29, %v919_v28 }
  0x68   : > { %1141 = vmatmul.mubr.f32.vlgmr.msra.gmra.mrb[0].mxu0 %v392_v31  ;;  %v921_v31 = vld [vmem:[%s1821_s2 + $0x160] sm:$0xff] }
  0x69   : > { %v1432_v33 = vpack.c.bf16 %v922_v32, %v921_v31 }
 0x13b   : > { %v1142_v45 = vpop.f32.mrb[0].mxu0 }
 0x13c   : > { %v493_v46 = vadd.f32 %v1142_v45, %v892_v44  ;;  %v476_v47 = vpop.f32.mrb[1].mxu0 }
 0x13d   : > { %v492_v48 = vadd.f32 %v892_v44, %v476_v47 }
 0x13e   : > { %v495_v51 = vmax.f32 %v493_v46, 0.0 }
 0x13f   : > { %v494_v52 = vmax.f32 %v492_v48, 0.0 }
 0x140   : > { %497 = vst [vmem:[#allocation2 + $0x9] sm:$0xff] %v495_v51 }
 0x141   : > { %496 = vst [vmem:[#allocation2 + $0x1] sm:$0xff] %v494_v52  ;;  %1175 = vmatprep.mubr.f32.mxu1 %v494_v52 }
 0x142   : > { %1176 = vmatmul.mubr.f32.vlgmr.msra.gmra.mrb[0].mxu1 %v495_v51 }
 0x143   : > { %1379 = vmatpush3.bf16.msra.mxu1 %v1376_v43 }
 0x144   : > { %1381 = vmatprep.subr.bf16.mxu1 %v1380_v53 }
 0x147   : > { %1383 = vmatpush3.bf16.msra.mxu1 %v1380_v53  ;;  %v686_v37 = vld [vmem:[#allocation2 + $0xa] sm:$0xff] }
 0x148   : > { %v498_v59 = vld [vmem:[#allocation2] sm:$0xff]  ;;  %1385 = vmatprep.subr.bf16.mxu1 %v1384_v56  ;;  %v499_v17 = vld [vmem:[#allocation2 + $0x8] sm:$0xff] }
 0x149   : > { %1210 = vmatprep.mubr.f32.mxu1 %v498_v59  ;;  %v685_v20 = vld [vmem:[#allocation2 + $0x2] sm:$0xff] }
 0x14b   : > { %1387 = vmatpush3.bf16.msra.mxu1 %v1384_v56 }
 0x14c   : > { %1389 = vmatprep.subr.bf16.mxu1 %v1388_v60 }
 0x14f   : > { %1391 = vmatpush3.bf16.msra.mxu1 %v1388_v60 }
 0x150   : > { %1393 = vmatprep.subr.bf16.mxu1 %v1392_v63 }
 0x153   : > { %1395 = vmatpush3.bf16.msra.mxu1 %v1392_v63 }
 0x154   : > { %1397 = vmatprep.subr.bf16.mxu1 %v1396_v2 }
 0x157   : > { %1399 = vmatpush3.bf16.msra.mxu1 %v1396_v2 }
 0x158   : > { %1401 = vmatprep.subr.bf16.mxu1 %v1400_v5 }
 0x15b   : > { %1403 = vmatpush3.bf16.msra.mxu1 %v1400_v5 }
 0x15c   : > { %1405 = vmatprep.subr.bf16.mxu1 %v1404_v8 }
 0x15f   : > { %1407 = vmatpush3.bf16.msra.mxu1 %v1404_v8 }
 0x160   : > { %1409 = vmatprep.subr.bf16.mxu1 %v1408_v11 }
 0x162   : > { %1211 = vmatmul.mubr.f32.vlgmr.msra.gmra.mrb[0].mxu1 %v499_v17 }
 0x163   : > { %1411 = vmatpush3.bf16.msra.mxu1 %v1408_v11  ;;  %1245 = vmatprep.mubr.f32.mxu1 %v685_v20 }
 0x164   : > { %1413 = vmatprep.subr.bf16.mxu1 %v1412_v16 }
 0x167   : > { %1415 = vmatpush3.bf16.msra.mxu1 %v1412_v16 }
 0x168   : > { %1417 = vmatprep.subr.bf16.mxu1 %v1416_v21 }
 0x16b   : > { %1419 = vmatpush3.bf16.msra.mxu1 %v1416_v21 }
 0x16c   : > { %1421 = vmatprep.subr.bf16.mxu1 %v1420_v24 }
 0x16f   : > { %1423 = vmatpush3.bf16.msra.mxu1 %v1420_v24 }
 0x170   : > { %1425 = vmatprep.subr.bf16.mxu1 %v1424_v27 }
 0x173   : > { %1427 = vmatpush3.bf16.msra.mxu1 %v1424_v27 }
 0x174   : > { %1429 = vmatprep.subr.bf16.mxu1 %v1428_v30 }
 0x177   : > { %1431 = vmatpush3.bf16.msra.mxu1 %v1428_v30 }
 0x178   : > { %1433 = vmatprep.subr.bf16.mxu1 %v1432_v33 }
 0x17b   : > { %1435 = vmatpush3.bf16.msra.mxu1 %v1432_v33 }
 0x17c   : > { %1437 = vmatprep.subr.bf16.mxu1 %v1436_v36 }
 0x17f   : > { %1439 = vmatpush3.bf16.msra.mxu1 %v1436_v36 }
 0x182   : > { %1246 = vmatmul.mubr.f32.vlgmr.msra.gmra.mrb[0].mxu1 %v686_v37 }
 0x255   : > { %v1247_v40 = vpop.f32.mrb[0].mxu1 }
 0x256   : > { %v787_v42 = vadd.f32 %v1247_v40, %v925_v38  ;;  %v770_v43 = vpop.f32.mrb[1].mxu1 }
 0x257   : > { %v786_v44 = vadd.f32 %v925_v38, %v770_v43 }
 0x258   : > { %v791_v45 = vadd.f32 %v789_v39, %v787_v42 }
 0x259   : > { %v790_v46 = vadd.f32 %v788_v41, %v786_v44 }
 0x25a   : > { %v793_v47 = vmax.f32 %v791_v45, 0.0 }
 0x25b   : > { %v792_v48 = vmax.f32 %v790_v46, 0.0 }
 0x25c   : > { %795 = vst [vmem:[%s197_s9 + $0x8] sm:$0xff] %v793_v47 }
 0x25d   : > { %794 = vst [vmem:[%s197_s9] sm:$0xff] %v792_v48 }
 0x25e PF: > { %s14_s15 = sadd.s32 1, %s1463_s15  }
 0x25f   : > { %p11_p4 = scmp.ge.s32.totalorder %s14_s15, 4  }
 0x261   :  { %13 = sbr.rel (!%p11_p4) target bundleno = 1 (0x1), region = 70 }

</bundles_post_ra>
